<compile_context>
chip_gen: v7x
topology: tpu7x:2x2x1
jax: 0.10.0
libtpu: 0.0.40
codegen_flags: <defaults>
</compile_context>

<pallas_src>
import numpy as np
import jax
import jax.numpy as jnp
from jax.experimental import pallas as pl
from jax.experimental.pallas import tpu as pltpu

FEAT_PAD = 128          # lane-dense feature / output width between layers
NEG_BIG = -1e30         # python float literal (not a captured constant)


def _elu(x):
    return jnp.where(x > 0, x, jnp.exp(x) - 1.0)


# ----------------------- per-layer projection kernel ------------------------
def _proj_kernel(x_ref, w_ref, asrc_t_ref, adst_p_ref,
                 xp_ref, asrc_out_ref, adst_out_ref):
    """Projects one node-row tile: xp = x@W (bf16), a_src^T [H,tile], a_dst [tile,H]."""
    xp = jnp.dot(x_ref[...].astype(jnp.bfloat16), w_ref[...],
                 preferred_element_type=jnp.float32)           # [tile, H*C] f32
    xp_bf = xp.astype(jnp.bfloat16)
    xp_ref[...] = xp_bf
    # source logits, already transposed: [H, tile] (no per-dst-tile transpose later)
    asrc_out_ref[...] = jax.lax.dot_general(
        asrc_t_ref[...], xp_bf,
        dimension_numbers=(((1,), (1,)), ((), ())),
        preferred_element_type=jnp.float32)
    # destination logits: [tile, H]
    adst_out_ref[...] = jnp.dot(xp_bf, adst_p_ref[...],
                                preferred_element_type=jnp.float32)


def gat_project_pallas(x_pad, W_bf, asrc_t_bf, adst_bf, H, C, tile=128):
    """x_pad: [N, FEAT_PAD] f32 -> (xp_bf [N,H*C] bf16, a_src [H,N] f32, a_dst [N,H] f32)."""
    N, Fpad = x_pad.shape
    HC = H * C
    assert N % tile == 0 and tile % 128 == 0
    n_tiles = N // tile
    return pl.pallas_call(
        _proj_kernel,
        out_shape=(
            jax.ShapeDtypeStruct((N, HC), jnp.bfloat16),
            jax.ShapeDtypeStruct((H, N), jnp.float32),
            jax.ShapeDtypeStruct((N, H), jnp.float32),
        ),
        grid_spec=pltpu.PrefetchScalarGridSpec(
            num_scalar_prefetch=0,
            grid=(n_tiles,),
            in_specs=[
                pl.BlockSpec((tile, Fpad), lambda i: (i, 0)),   # x tile
                pl.BlockSpec((Fpad, HC), lambda i: (0, 0)),     # W (bf16)
                pl.BlockSpec((H, HC), lambda i: (0, 0)),        # att_src^T
                pl.BlockSpec((HC, H), lambda i: (0, 0)),        # att_dst
            ],
            out_specs=[
                pl.BlockSpec((tile, HC), lambda i: (i, 0)),     # xp tile (bf16)
                pl.BlockSpec((H, tile), lambda i: (0, i)),      # a_src^T tile
                pl.BlockSpec((tile, H), lambda i: (i, 0)),      # a_dst tile
            ],
        ),
        compiler_params=pltpu.CompilerParams(
            dimension_semantics=("parallel",)),
    )(x_pad, W_bf, asrc_t_bf, adst_bf)


# ----------------------- per-layer aggregation kernel -----------------------
def _gat_agg_kernel(H, C, out_pad, concat, apply_elu, score_bf16):
    """Attention softmax + neighbourhood aggregation over one dst-row tile."""
    inv_H = 1.0 / float(H)

    def kernel(xp_ref, asrc_ref, adst_ref, adj_ref, b_ref, o_ref):
        xp_bf = xp_ref[...]                  # [N, H*C] bf16 (all sources)
        a_src = asrc_ref[...]                # [H, N]    f32
        a_dst = adst_ref[...]                # [tile, H] f32
        edge = adj_ref[...] != 0             # [tile, N] bool (no f32 mask temps)

        head_outs = []
        for h in range(H):
            # fused score chain, all values (no store/reload round-trips)
            e = a_dst[:, h:h + 1] + a_src[h:h + 1, :]          # [tile, N] f32
            e = jnp.where(e > 0, e, 0.2 * e)                   # LeakyReLU(0.2)
            e = jnp.where(edge, e, NEG_BIG)                    # mask non-edges
            e = e - jnp.max(e, axis=-1, keepdims=True)
            if score_bf16:                                     # v6e/v7x bf16 EUP/VPU
                p = jnp.exp(e.astype(jnp.bfloat16))            # [tile, N] bf16
                rowsum = jnp.sum(p.astype(jnp.float32), axis=-1, keepdims=True)
            else:                                              # v5e: stay f32
                pf = jnp.exp(e)
                rowsum = jnp.sum(pf, axis=-1, keepdims=True)
                p = pf.astype(jnp.bfloat16)
            out_h = jnp.dot(p, xp_bf[:, h * C:(h + 1) * C],
                            preferred_element_type=jnp.float32)    # [tile, C]
            # normalise AFTER aggregation: EUP reciprocal, no [tile,N] divides
            out_h = out_h * pl.reciprocal(jnp.maximum(rowsum, 1e-20),
                                          approx=True)
            head_outs.append(out_h)

        if concat:
            out = jnp.concatenate(head_outs, axis=-1)          # [tile, H*C]
            width = H * C
        else:
            out = head_outs[0]
            for h in range(1, H):
                out = out + head_outs[h]
            out = out * inv_H
            width = C

        pad = out_pad - width
        if pad > 0:   # keep features lane-dense (padded to 128) between layers
            out = jnp.concatenate(
                [out, jnp.zeros((out.shape[0], pad), jnp.float32)], axis=-1)
        out = out + b_ref[...]
        if apply_elu:
            out = _elu(out)              # elu(0)=0 -> padded lanes stay zero
        o_ref[...] = out                 # ONE lane-dense 128-wide store

    return kernel


def _vmem_cap_bytes():
    try:
        return int(pltpu.get_tpu_info().vmem_capacity_bytes)
    except Exception:
        return 64 * 1024 * 1024          # v7x-safe fallback


def _agg_vmem_bytes(N, tile, HC, out_pad):
    need = (
        2 * N * HC * 2                   # xp_bf all-sources (double-buffered)
        + 2 * tile * N                   # adj int8 dst tiles (double-buffered)
        + 2 * tile * out_pad * 4         # output tiles (double-buffered)
        + 2 * (tile + N) * 8 * 4         # a_dst / a_src small blocks
        + 6 * tile * N * 4               # live f32/bf16 score temporaries
        + (2 << 20)                      # weights, bias, slack
    )
    cap = int(0.9 * _vmem_cap_bytes())
    return int(min(max(int(need * 1.25), 16 * 1024 * 1024), cap))


def gat_aggregate_pallas(xp_bf, a_src, a_dst, adj_i8, bias_pad,
                         H, C, concat, apply_elu, score_bf16, tile=128):
    N, HC = xp_bf.shape
    out_pad = bias_pad.shape[1]
    assert N % tile == 0 and tile % 128 == 0     # covers int8/bf16/f32 tiling
    n_tiles = N // tile
    return pl.pallas_call(
        _gat_agg_kernel(H, C, out_pad, concat, apply_elu, score_bf16),
        out_shape=jax.ShapeDtypeStruct((N, out_pad), jnp.float32),
        grid_spec=pltpu.PrefetchScalarGridSpec(
            num_scalar_prefetch=0,
            grid=(n_tiles,),
            in_specs=[
                pl.BlockSpec((N, HC), lambda i: (0, 0)),        # xp all sources
                pl.BlockSpec((H, N), lambda i: (0, 0)),         # a_src^T
                pl.BlockSpec((tile, H), lambda i: (i, 0)),      # a_dst tile
                pl.BlockSpec((tile, N), lambda i: (i, 0)),      # adj tile (int8)
                pl.BlockSpec((1, out_pad), lambda i: (0, 0)),   # bias (padded)
            ],
            out_specs=pl.BlockSpec((tile, out_pad), lambda i: (i, 0)),
        ),
        compiler_params=pltpu.CompilerParams(
            dimension_semantics=("parallel",),
            vmem_limit_bytes=_agg_vmem_bytes(N, tile, HC, out_pad),
        ),
    )(xp_bf, a_src, a_dst, adj_i8, bias_pad)


# ----------------------------- mean pooling ---------------------------------
def _pool_kernel(seg_ref, x_ref, o_ref):
    # global_mean_pool as a matmul with a per-graph averaging matrix.
    o_ref[...] = jnp.dot(seg_ref[...], x_ref[...],
                         preferred_element_type=jnp.float32)


def global_mean_pool_pallas(seg, x):
    G = seg.shape[0]
    D = x.shape[1]
    return pl.pallas_call(
        _pool_kernel,
        out_shape=jax.ShapeDtypeStruct((G, D), jnp.float32),
        in_specs=[pl.BlockSpec(memory_space=pltpu.MemorySpace.VMEM),
                  pl.BlockSpec(memory_space=pltpu.MemorySpace.VMEM)],
        out_specs=pl.BlockSpec(memory_space=pltpu.MemorySpace.VMEM),
    )(seg, x)


# ----------------------- pure-JAX reference (checking) ----------------------
def gat_layer_ref(x_pad, adj, W_bf, asrc_t_bf, adst_bf, bias_pad,
                  H, C, concat, apply_elu, score_bf16):
    """Mirrors the kernels' bf16-matmul / f32-accumulate / score-math numerics."""
    bf = jnp.bfloat16
    xp = jnp.dot(x_pad.astype(bf), W_bf, preferred_element_type=jnp.float32)
    xp_bf = xp.astype(bf)
    a_src = jax.lax.dot_general(asrc_t_bf, xp_bf, (((1,), (1,)), ((), ())),
                                preferred_element_type=jnp.float32)   # [H, N]
    a_dst = jnp.dot(xp_bf, adst_bf, preferred_element_type=jnp.float32)  # [N, H]
    outs = []
    for h in range(H):
        e = a_dst[:, h:h + 1] + a_src[h:h + 1, :]                     # [dst, src]
        e = jnp.where(e > 0, e, 0.2 * e)
        e = jnp.where(adj > 0, e, NEG_BIG)
        e = e - e.max(axis=-1, keepdims=True)
        if score_bf16:
            p = jnp.exp(e.astype(bf))
            s = jnp.sum(p.astype(jnp.float32), axis=-1, keepdims=True)
        else:
            pf = jnp.exp(e)
            s = pf.sum(axis=-1, keepdims=True)
            p = pf.astype(bf)
        o = jnp.dot(p, xp_bf[:, h * C:(h + 1) * C],
                    preferred_element_type=jnp.float32) / s
        outs.append(o)
    out = jnp.concatenate(outs, axis=-1) if concat else sum(outs) / H
    out = out + bias_pad[0, :out.shape[-1]]
    if apply_elu:
        out = _elu(out)
    return out


# --------------------------------- demo -------------------------------------
if __name__ == "__main__":
    input_dim, hidden_dim, output_dim = 8, 16, 8
    heads, num_layers = 4, 3
    N_per_graph, G = 128, 2
    N = N_per_graph * G
    E_per_graph = 400
    TILE = 128                       # 2 dst tiles -> even split across v7x TCs

    # bf16 score math only where the VPU/EUP have a bf16 path (v6e / v7x)
    dev_kind = jax.devices()[0].device_kind.lower()
    score_bf16 = not any(v in dev_kind for v in ("v2", "v3", "v4", "v5"))

    key = jax.random.PRNGKey(0)
    k_x, k_e, k_w = jax.random.split(key, 3)

    x = jax.random.normal(k_x, (N, input_dim), jnp.float32)

    # random intra-graph edges, COO [2, E]
    srcs, dsts = [], []
    ekeys = jax.random.split(k_e, 2 * G)
    for g in range(G):
        lo, hi = g * N_per_graph, (g + 1) * N_per_graph
        srcs.append(jax.random.randint(ekeys[2 * g], (E_per_graph,), lo, hi))
        dsts.append(jax.random.randint(ekeys[2 * g + 1], (E_per_graph,), lo, hi))
    src = jnp.concatenate(srcs)
    dst = jnp.concatenate(dsts)
    batch = jnp.repeat(jnp.arange(G), N_per_graph)              # [N]

    # dense adjacency A[dst, src] = 1, plus self loops (GATConv default)
    adj_f32 = jnp.zeros((N, N), jnp.float32).at[dst, src].set(1.0)
    adj_f32 = jnp.maximum(adj_f32, jnp.eye(N, dtype=jnp.float32))
    adj_i8 = adj_f32.astype(jnp.int8)                           # 4x less HBM/VMEM

    # ----- deterministic parameter init (same structure as the nn.Module) ----
    layer_dims = [(input_dim, heads, hidden_dim, True)]
    for _ in range(num_layers - 2):
        layer_dims.append((hidden_dim * heads, heads, hidden_dim, True))
    layer_dims.append((hidden_dim * heads, 1, output_dim, False))

    params = []
    wkeys = jax.random.split(k_w, 3 * num_layers)
    for li, (fin, H, C, concat) in enumerate(layer_dims):
        kw, ks, kd = wkeys[3 * li], wkeys[3 * li + 1], wkeys[3 * li + 2]
        scale = (2.0 / (fin + H * C)) ** 0.5
        W = scale * jax.random.normal(kw, (fin, H * C), jnp.float32)
        W_pad = jnp.zeros((FEAT_PAD, H * C), jnp.float32).at[:fin, :].set(W)
        att_src = 0.1 * np.asarray(jax.random.normal(ks, (H, C), jnp.float32))
        att_dst = 0.1 * np.asarray(jax.random.normal(kd, (H, C), jnp.float32))
        # head-block forms so the kernels need no reshapes/transposes
        asrc_t = np.zeros((H, H * C), np.float32)   # [H, H*C]
        adst_m = np.zeros((H * C, H), np.float32)   # [H*C, H]
        for h in range(H):
            asrc_t[h, h * C:(h + 1) * C] = att_src[h]
            adst_m[h * C:(h + 1) * C, h] = att_dst[h]
        width = H * C if concat else C
        bias_pad = jnp.zeros((1, FEAT_PAD), jnp.float32).at[0, :width].set(
            0.01 * (li + 1))
        params.append(dict(
            W=W_pad.astype(jnp.bfloat16),
            asrc_t=jnp.asarray(asrc_t).astype(jnp.bfloat16),
            adst=jnp.asarray(adst_m).astype(jnp.bfloat16),
            bias=bias_pad, H=H, C=C, concat=concat, width=width))

    # ----- forward pass -----
    h_pad = jnp.zeros((N, FEAT_PAD), jnp.float32).at[:, :input_dim].set(x)
    h_ref = x
    for li, p in enumerate(params):
        apply_elu = li < num_layers - 1
        # F.dropout(training=False) / attention dropout are identity: omitted.
        xp_bf, a_src, a_dst = gat_project_pallas(
            h_pad, p["W"], p["asrc_t"], p["adst"], p["H"], p["C"], tile=TILE)
        h_pad = gat_aggregate_pallas(
            xp_bf, a_src, a_dst, adj_i8, p["bias"], p["H"], p["C"],
            p["concat"], apply_elu, score_bf16, tile=TILE)
        # reference
        h_ref_pad = jnp.zeros((N, FEAT_PAD), jnp.float32
                              ).at[:, :h_ref.shape[1]].set(h_ref)
        h_ref = gat_layer_ref(h_ref_pad, adj_f32, p["W"], p["asrc_t"],
                              p["adst"], p["bias"], p["H"], p["C"],
                              p["concat"], apply_elu, score_bf16)

    node_emb = h_pad[:, :output_dim]

    # global_mean_pool(x, batch) as a Pallas matmul with an averaging matrix
    counts = jnp.bincount(batch, length=G).astype(jnp.float32)
    seg = (jnp.arange(G)[:, None] == batch[None, :]).astype(jnp.float32)
    seg = seg / counts[:, None]
    graph_emb = global_mean_pool_pallas(seg, h_pad)[:, :output_dim]
    graph_emb_ref = seg @ h_ref

    jax.block_until_ready((graph_emb, node_emb))

    # tolerance covers approx-reciprocal + MXU accumulation-order differences
    np.testing.assert_allclose(np.asarray(node_emb), np.asarray(h_ref),
                               rtol=2e-2, atol=2e-2)
    np.testing.assert_allclose(np.asarray(graph_emb),
                               np.asarray(graph_emb_ref),
                               rtol=2e-2, atol=2e-2)
    assert graph_emb.shape == (G, output_dim)
    assert node_emb.shape == (N, output_dim)
    print("KERNEL_OK")
</pallas_src>

<mosaic_0001>
module attributes {stable_mosaic.version = 11 : i64} {
  func.func @_proj_kernel(%arg0: i32, %arg1: memref<128x128xf32, #tpu.memory_space<vmem>>, %arg2: memref<128x64xbf16, #tpu.memory_space<vmem>>, %arg3: memref<4x64xbf16, #tpu.memory_space<vmem>>, %arg4: memref<64x4xbf16, #tpu.memory_space<vmem>>, %arg5: memref<128x64xbf16, #tpu.memory_space<vmem>>, %arg6: memref<4x128xf32, #tpu.memory_space<vmem>>, %arg7: memref<128x4xf32, #tpu.memory_space<vmem>>) attributes {dimension_semantics = [#tpu.dimension_semantics<parallel>], iteration_bounds = array<i64: 2>, scalar_prefetch = 0 : i64, scratch_operands = 0 : i64, tpu.core_type = #tpu.core_type<tc>, window_params = [{transform_indices = @transform_0, window_bounds = array<i64: 128, 128>}, {pipeline_mode = #tpu.pipeline_mode<synchronous>, transform_indices = @transform_1, window_bounds = array<i64: 128, 64>}, {pipeline_mode = #tpu.pipeline_mode<synchronous>, transform_indices = @transform_2, window_bounds = array<i64: 4, 64>}, {pipeline_mode = #tpu.pipeline_mode<synchronous>, transform_indices = @transform_3, window_bounds = array<i64: 64, 4>}, {transform_indices = @transform_4, window_bounds = array<i64: 128, 64>}, {transform_indices = @transform_5, window_bounds = array<i64: 4, 128>}, {transform_indices = @transform_6, window_bounds = array<i64: 128, 4>}]} {
    %c0 = arith.constant 0 : index
    %c0_0 = arith.constant 0 : index
    %0 = vector.load %arg1[%c0, %c0_0] : memref<128x128xf32, #tpu.memory_space<vmem>>, vector<128x128xf32>
    %1 = arith.truncf %0 : vector<128x128xf32> to vector<128x128xbf16>
    %c0_1 = arith.constant 0 : index
    %c0_2 = arith.constant 0 : index
    %2 = vector.load %arg2[%c0_1, %c0_2] : memref<128x64xbf16, #tpu.memory_space<vmem>>, vector<128x64xbf16>
    %cst = arith.constant dense<0.000000e+00> : vector<128x64xf32>
    %3 = tpu.matmul %1, %2, %cst {dimension_numbers = #tpu.dot_dimension_numbers<[1], [0], [0], [1], [0, 0, 1, 1], [], []>} : vector<128x128xbf16>, vector<128x64xbf16>, vector<128x64xf32> -> vector<128x64xf32>
    %4 = arith.truncf %3 : vector<128x64xf32> to vector<128x64xbf16>
    %c0_3 = arith.constant 0 : index
    %c0_4 = arith.constant 0 : index
    %5 = vector.load %arg5[%c0_3, %c0_4] : memref<128x64xbf16, #tpu.memory_space<vmem>>, vector<128x64xbf16>
    tpu.vector_store %arg5[%c0_3, %c0_4], %4 {strides = array<i32>} : memref<128x64xbf16, #tpu.memory_space<vmem>>, vector<128x64xbf16>,
    %c0_5 = arith.constant 0 : index
    %c0_6 = arith.constant 0 : index
    %6 = vector.load %arg3[%c0_5, %c0_6] : memref<4x64xbf16, #tpu.memory_space<vmem>>, vector<4x64xbf16>
    %cst_7 = arith.constant dense<0.000000e+00> : vector<4x128xf32>
    %7 = tpu.matmul %6, %4, %cst_7 {dimension_numbers = #tpu.dot_dimension_numbers<[1], [1], [0], [0], [0, 0, 1, 0], [], []>} : vector<4x64xbf16>, vector<128x64xbf16>, vector<4x128xf32> -> vector<4x128xf32>
    %c0_8 = arith.constant 0 : index
    %c0_9 = arith.constant 0 : index
    %8 = vector.load %arg6[%c0_8, %c0_9] : memref<4x128xf32, #tpu.memory_space<vmem>>, vector<4x128xf32>
    tpu.vector_store %arg6[%c0_8, %c0_9], %7 {strides = array<i32>} : memref<4x128xf32, #tpu.memory_space<vmem>>, vector<4x128xf32>,
    %c0_10 = arith.constant 0 : index
    %c0_11 = arith.constant 0 : index
    %9 = vector.load %arg4[%c0_10, %c0_11] : memref<64x4xbf16, #tpu.memory_space<vmem>>, vector<64x4xbf16>
    %cst_12 = arith.constant dense<0.000000e+00> : vector<128x4xf32>
    %10 = tpu.matmul %4, %9, %cst_12 {dimension_numbers = #tpu.dot_dimension_numbers<[1], [0], [0], [1], [0, 0, 1, 1], [], []>} : vector<128x64xbf16>, vector<64x4xbf16>, vector<128x4xf32> -> vector<128x4xf32>
    %c0_13 = arith.constant 0 : index
    %c0_14 = arith.constant 0 : index
    %11 = vector.load %arg7[%c0_13, %c0_14] : memref<128x4xf32, #tpu.memory_space<vmem>>, vector<128x4xf32>
    tpu.vector_store %arg7[%c0_13, %c0_14], %10 {strides = array<i32>} : memref<128x4xf32, #tpu.memory_space<vmem>>, vector<128x4xf32>,
    return
  }
  func.func @transform_0(%arg0: i32) -> (i32, i32) {
    %c0_i32 = arith.constant 0 : i32
    %c0_i32_0 = arith.constant 0 : i32
    return %arg0, %c0_i32 : i32, i32
  }
  func.func @transform_1(%arg0: i32) -> (i32, i32) {
    %c0_i32 = arith.constant 0 : i32
    %c0_i32_0 = arith.constant 0 : i32
    %c0_i32_1 = arith.constant 0 : i32
    return %c0_i32, %c0_i32_0 : i32, i32
  }
  func.func @transform_2(%arg0: i32) -> (i32, i32) {
    %c0_i32 = arith.constant 0 : i32
    %c0_i32_0 = arith.constant 0 : i32
    %c0_i32_1 = arith.constant 0 : i32
    return %c0_i32, %c0_i32_0 : i32, i32
  }
  func.func @transform_3(%arg0: i32) -> (i32, i32) {
    %c0_i32 = arith.constant 0 : i32
    %c0_i32_0 = arith.constant 0 : i32
    %c0_i32_1 = arith.constant 0 : i32
    return %c0_i32, %c0_i32_0 : i32, i32
  }
  func.func @transform_4(%arg0: i32) -> (i32, i32) {
    %c0_i32 = arith.constant 0 : i32
    %c0_i32_0 = arith.constant 0 : i32
    return %arg0, %c0_i32 : i32, i32
  }
  func.func @transform_5(%arg0: i32) -> (i32, i32) {
    %c0_i32 = arith.constant 0 : i32
    %c0_i32_0 = arith.constant 0 : i32
    return %c0_i32, %arg0 : i32, i32
  }
  func.func @transform_6(%arg0: i32) -> (i32, i32) {
    %c0_i32 = arith.constant 0 : i32
    %c0_i32_0 = arith.constant 0 : i32
    return %arg0, %c0_i32 : i32, i32
  }
}

</mosaic_0001>

<bundles_post_ra>
// kernel: tpu_custom_call.1
= control target key start
LH: loop header
LB: loop body
LE: loop exit
PB: predicated region body
PF: predicated region fallthrough
CT: control target
= control target key end

     0   :  { %12 = vsyncpa [#allocation3], 0  ;;  %s1673_s0 = inlined_call_operand.hbm [shape: f32[256,128], index: 0, kind: input, shape index: {}]   ;;  %s1674_s1 = inlined_call_operand.vmem [shape: bf16[128,64], index: 1, kind: input, shape index: {}]   ;;  %s1675_s2 = inlined_call_operand.vmem [shape: bf16[4,64], index: 2, kind: input, shape index: {}]   ;;  %s1676_s3 = inlined_call_operand.vmem [shape: bf16[64,4], index: 3, kind: input, shape index: {}]   ;;  %s1677_s4 = inlined_call_operand.vmem [shape: bf16[256,64], index: 4, kind: output, shape index: {0}]   ;;  %s1678_s5 = inlined_call_operand.hbm [shape: f32[4,256], index: 5, kind: output, shape index: {1}]   ;;  %s1679_s6 = inlined_call_operand.vmem [shape: f32[256,4], index: 6, kind: output, shape index: {2}]  }
   0x1   :  { %14 = vsyncpa [#allocation3 + $0x1], 0 }
   0x2   :  { %15 = vsyncpa [#allocation4], 0 }
   0x3   :  { %17 = vsyncpa [#allocation4 + $0x1], 0  ;;  %s1326_s21 = smov 0   ;;  %s1328_s22 = smov 0  }
   0x4   :  { %s1330_s23 = smov 0   ;;  %s1332_s24 = smov 0  }
   0x5 LB: > { %s1347_s25 = sadd.s32 4294967295, %s1283_s24   ;;  %s933_s26 = sadd.s32 4294967294, %s1283_s24   ;;  %s1283_s24 = sphi %s1332_s24, %s1692_s24   ;;  %s1279_s23 = sphi %s1330_s23, %s1691_s23   ;;  %s1275_s22 = sphi %s1328_s22, %s1690_s22   ;;  %s1271_s21 = sphi %s1326_s21, %s1689_s21  }
   0x6   : > { %s1351_s27 = sadd.s32 1, %s1283_s24   ;;  %s30_s28 = sadd.s32 1, %s1279_s23 }
   0x7   : > { %s27_s29 = ssub.s32 %s1283_s24, %s1351_s27  ;;  %p37_p0 = scmp.ne.s32.totalorder %s1279_s23, %s1275_s22 }
   0x8   : > { %p28_p1 = scmp.eq.s32.totalorder %s27_s29, 0  ;;  %p38_p2 = scmp.eq.s32.totalorder %s1283_s24, 0 }
   0x9   : > { %p43_p3 = scmp.ne.s32.totalorder %s1275_s22, %s1271_s21  ;;  %p44_p4 = scmp.eq.s32.totalorder %s1347_s25, 0 }
   0xa   : > { %s1363_s30 = scalar_select %p28_p1, %s1279_s23, %s30_s28  }
   0xb   : > { %p1365_p5 = por %p38_p2, %p37_p0  ;;  %p1369_p6 = por %p44_p4, %p43_p3 }
   0xc   : > { %p156_p7 = scmp.eq.s32.totalorder %s1347_s25, 1  ;;  %p162_p8 = scmp.eq.s32.totalorder %s933_s26, 1 }
   0xd   : > { %p1137_p10 = scmp.lt.s32.totalorder %s1283_s24, 2  ;;  %s217_s11 = sand.u32 1, %s1279_s23  }
   0xe   : > { %p1376_p11 = por %p156_p7, %p37_p0  ;;  %p1380_p12 = por %p162_p8, %p43_p3 }
   0xf   : > { %s987_s12 = sshll.u32 %s1283_s24, 11  ;;  %s936_s13 = sshll.u32 %s217_s11, 7 }
  0x10   : > { %s1683_s9 = scalar_select %p1376_p11, 1, 0 }
  0x11   : > { %s1684_s10 = scalar_select %p1380_p12, 1, 0 }
  0x12   : > { %s1389_s16 = scalar_lea.hbm %s1673_s0, %s987_s12  ;;  %s221_s17 = scalar_lea.vmem [#allocation2], %s936_s13 }
  0x13   : > { %s228_s18 = sshll.u32 %s221_s17, 4  ;;  %p1393_p13 = pnand %p1137_p10, %p1365_p5  ;;  %s1397_s18 = int_to_ptr.vmem [resolvable:$true] %s228_s18 }
  0x14   : > { %s1399_s20 = scalar_lea.sflag [#allocation3], %s217_s11  ;;  %s1187_s26 = scalar_lea.hbm %s1389_s16, 2048 }
  0x15   : > { %p1188_p0 = scmp.ne.s32.totalorder %s1389_s16, %s1187_s26  ;;  %p1189_p1 = pneg %p1393_p13 }
  0x16   : > { %s1192_s7 = scalar_lea.hbm %s1673_s0, 4096  ;;  %p1193_p4 = scmp.lt.u32.totalorder %s1389_s16, %s1673_s0 }
  0x17   : > { %p1190_p2 = pnand %p1189_p1, %p1188_p0  ;;  %p1194_p5 = scmp.lt.u32.totalorder %s1192_s7, %s1187_s26 }
  0x18   : > { %p1196_p8 = scmp.lt.u32.totalorder %s1187_s26, %s1389_s16 }
  0x19   : > { %p1191_p3 = pneg %p1190_p2  ;;  %p1195_p7 = por %p1194_p5, %p1193_p4 }
  0x1b   : > { %p1197_p10 = por %p1196_p8, %p1195_p7 }
  0x1d   : > { %p1198_p9 = pnand %p1197_p10, %p1191_p3 }
  0x1f   : > { %1201 = shalt.err (!%p1198_p9)
}
  0x20   : > { %s1202_s11 = scalar_lea.vmem %s1397_s18, 2048  ;;  %s1285_s14 = smov [#allocation2]  }
  0x21   : > { %p1203_p0 = scmp.ne.s32.totalorder %s1397_s18, %s1202_s11  ;;  %s1207_s15 = sshll.u32 %s1285_s14, 4  ;;  %s1208_s15 = int_to_ptr.vmem [resolvable:$false] %s1207_s15 }
  0x22   : > { %s1209_s17 = scalar_lea.vmem %s1208_s15, 4096  ;;  %p1210_p11 = scmp.lt.s32.totalorder %s1397_s18, %s1208_s15 }
  0x23   : > { %p1205_p2 = pnand %p1203_p0, %p1189_p1  ;;  %p1211_p4 = scmp.lt.s32.totalorder %s1209_s17, %s1202_s11 }
  0x25   : > { %p1206_p12 = pneg %p1205_p2  ;;  %p1212_p5 = por %p1211_p4, %p1210_p11 }
  0x27   : > { %p1213_p7 = pnand %p1212_p5, %p1206_p12 }
  0x29   : > { %1216 = shalt.err (!%p1213_p7)
}
  0x2a   : > { %s1286_s26 = smov 128   ;;  %s1287_s28 = smov 8  }
  0x2b   : > { %1132 = dma.hbm_to_vmem [thread:$0]  (!%p1393_p13), %s1389_s16, 2048, %s1397_s18, %s1399_s20, %s1286_s26, %s1286_s26, %s1287_s28  }
  0x2c   : > { %p939_p9 = scmp.ge.s32.totalorder %s1283_s24, 1  ;;  %p236_p1 = scmp.lt.s32.totalorder %s1283_s24, 3 }
  0x2e   : > { %p237_p3 = pnand %p939_p9, %p236_p1 }
  0x2f   : > { %s1430_s29 = sand.u32 (!%p237_p3), 1, %s1275_s22  }
  0x30   : > { %240 = sbr.rel (%p237_p3) target bundleno = 602 (0x25a), region = 36  ;;  %s940_s7 = sshll.u32 (!%p237_p3), %s1430_s29, 7 }
  0x31   : > { %s243_s12 = scalar_lea.sflag (!%p237_p3), [#allocation3], %s1430_s29  ;;  %s1434_s13 = scalar_lea.vmem (!%p237_p3), [#allocation2], %s940_s7 }
  0x37   : > { %1262 = dma.done.wait (%p1369_p6), %s243_s12, 2048  }
  0x38   : > { %1264 = vsyncadd (%p1369_p6), %s243_s12, 4294965248  ;;  %v1175_v0 = vld [vmem:[%s1674_s1] sm:$0xff]   ;;  %v1176_v1 = vld [vmem:[%s1674_s1 + $0x8] sm:$0xff]   ;;  %v1288_v36 = vmov 0.0   ;;  %vm1289_vm0 = vmmov 0   ;;  %s942_s7 = sshll.u32 %s1347_s25, 4 }
  0x39   : > { %1041 = vmatprep.subr.bf16.mxu0 %v1175_v0  ;;  %v1177_v2 = vld [vmem:[%s1674_s1 + $0x10] sm:$0xff]   ;;  %v1178_v3 = vld [vmem:[%s1674_s1 + $0x18] sm:$0xff]   ;;  %v299_v4 = vld [vmem:[%s1434_s13] sm:$0xff]  ;;  %1073 = vmatprep.subr.bf16.mxu1 %v1288_v36  ;;  %p287_p6 = scmp.lt.s32.totalorder %s942_s7, 31  ;;  %vm548_vm1 = vcmask 519168   ;;  %vm566_vm2 = vcmask 523264  }
  0x3a   : > { %1042 = vmatpush3.bf16.msra.mxu0 %v1175_v0  ;;  %v300_v5 = vld [vmem:[%s1434_s13 + $0x8] sm:$0xff]  ;;  %v1179_v7 = vld [vmem:[%s1674_s1 + $0x20] sm:$0xff]   ;;  %v1181_v9 = vld [vmem:[%s1674_s1 + $0x30] sm:$0xff]   ;;  %1089 = vmatprep.mubr.msk.bf16.mxu1 %vm1289_vm0, %v1288_v36  ;;  %vm764_vm3 = vcmask 31744   ;;  %s941_s17 = sshll.u32 %s1430_s29, 2  ;;  %p1686_p12 = scmp.ne.s32.totalorder %s1683_s9, 0 }
  0x3b   : > { %1043 = vmatprep.subr.bf16.mxu0 %v1176_v1  ;;  %v315_v6 = vpack.c.bf16 %v300_v5, %v299_v4  ;;  %v1180_v8 = vld [vmem:[%s1674_s1 + $0x28] sm:$0xff]   ;;  %v1182_v10 = vld [vmem:[%s1674_s1 + $0x38] sm:$0xff]   ;;  %v301_v11 = vld [vmem:[%s1434_s13 + $0x10] sm:$0xff]  ;;  %s1694_s7 = smov (!%p287_p6, %s942_s7), 31  ;;  %s277_s26 = scalar_lea.vmem [#allocation5], %s941_s17 }
  0x3c   : > { %v302_v12 = vld [vmem:[%s1434_s13 + $0x18] sm:$0xff]  ;;  %v303_v13 = vld [vmem:[%s1434_s13 + $0x20] sm:$0xff]  ;;  %v304_v14 = vld [vmem:[%s1434_s13 + $0x28] sm:$0xff]  ;;  %s945_s11 = sshll.u32 %s1694_s7, 3  ;;  %s809_s28 = sshll.u32 %s277_s26, 4  ;;  %s1618_s28 = int_to_ptr.vmem [resolvable:$true] %s809_s28 }
  0x3d   : > { %1057 = vmatprep.mubr.bf16.mxu0 %v315_v6  ;;  %v1473_v15 = vld [vmem:[%s1676_s3] sm:$0xff]   ;;  %v316_v16 = vpack.c.bf16 %v302_v12, %v301_v11  ;;  %v317_v17 = vpack.c.bf16 %v304_v14, %v303_v13  ;;  %v1479_v18 = vld [vmem:[%s1676_s3 + $0x8] sm:$0xff]   ;;  %v305_v19 = vld [vmem:[%s1434_s13 + $0x30] sm:$0xff]  ;;  %s1590_s15 = scalar_lea.vmem %s1679_s6, %s945_s11  ;;  %s1217_s19 = scalar_lea.vmem %s1618_s28, 64 }
  0x3e   : > { %1044 = vmatpush3.bf16.msra.mxu0 %v1176_v1  ;;  %v306_v20 = vld [vmem:[%s1434_s13 + $0x38] sm:$0xff]  ;;  %v307_v21 = vld [vmem:[%s1434_s13 + $0x40] sm:$0xff]  ;;  %v308_v22 = vld [vmem:[%s1434_s13 + $0x48] sm:$0xff]  ;;  %p1218_p11 = scmp.ne.s32.totalorder %s1618_s28, %s1217_s19 }
  0x3f   : > { %1045 = vmatprep.subr.bf16.mxu0 %v1177_v2  ;;  %v1490_v23 = vld [vmem:[%s1676_s3 + $0x10] sm:$0xff]   ;;  %v318_v24 = vpack.c.bf16 %v306_v20, %v305_v19  ;;  %v319_v25 = vpack.c.bf16 %v308_v22, %v307_v21  ;;  %v310_v27 = vld [vmem:[%s1434_s13 + $0x58] sm:$0xff]  ;;  %v311_v28 = vld [vmem:[%s1434_s13 + $0x60] sm:$0xff] }
  0x40   : > { %v309_v26 = vld [vmem:[%s1434_s13 + $0x50] sm:$0xff]  ;;  %v312_v29 = vld [vmem:[%s1434_s13 + $0x68] sm:$0xff]  ;;  %v314_v33 = vld [vmem:[%s1434_s13 + $0x78] sm:$0xff]  ;;  %p1219_p13 = pnand %p1218_p11, %p1686_p12 }
  0x41   : > { %v320_v30 = vpack.c.bf16 %v310_v27, %v309_v26  ;;  %v321_v31 = vpack.c.bf16 %v312_v29, %v311_v28  ;;  %v313_v32 = vld [vmem:[%s1434_s13 + $0x70] sm:$0xff]  ;;  %v1504_v35 = vld [vmem:[%s1676_s3 + $0x18] sm:$0xff]   ;;  %s943_s13 = sshll.u32 %s1694_s7, 2  ;;  %s984_s7 = sshll.u32 %s1347_s25, 6 }
  0x42   : > { %1046 = vmatpush3.bf16.msra.mxu0 %v1177_v2  ;;  %v322_v34 = vpack.c.bf16 %v314_v33, %v313_v32  ;;  %s1517_s18 = scalar_lea.vmem %s1677_s4, %s943_s13  ;;  %s1623_s16 = scalar_lea.hbm %s1678_s5, %s984_s7 }
  0x43   : > { %1047 = vmatprep.subr.bf16.mxu0 %v1178_v3  ;;  %p1220_p8 = pneg %p1219_p13  ;;  %s1290_s25 = smov [#allocation5]  }
  0x44   : > { %s1221_s20 = sshll.u32 %s1290_s25, 4  ;;  %s1222_s20 = int_to_ptr.vmem [resolvable:$false] %s1221_s20 }
  0x45   : > { %s1223_s11 = scalar_lea.vmem %s1222_s20, 128  ;;  %p1224_p10 = scmp.lt.s32.totalorder %s1618_s28, %s1222_s20 }
  0x46   : > { %1048 = vmatpush3.bf16.msra.mxu0 %v1178_v3  ;;  %p1225_p0 = scmp.lt.s32.totalorder %s1223_s11, %s1217_s19 }
  0x47   : > { %1049 = vmatprep.subr.bf16.mxu0 %v1179_v7 }
  0x48   : > { %p1226_p2 = por %p1225_p0, %p1224_p10 }
  0x4a   : > { %1050 = vmatpush3.bf16.msra.mxu0 %v1179_v7  ;;  %p1227_p4 = pnand %p1226_p2, %p1220_p8 }
  0x4b   : > { %1051 = vmatprep.subr.bf16.mxu0 %v1180_v8 }
  0x4e   : > { %1052 = vmatpush3.bf16.msra.mxu0 %v1180_v8 }
  0x4f   : > { %1053 = vmatprep.subr.bf16.mxu0 %v1181_v9 }
  0x52   : > { %1054 = vmatpush3.bf16.msra.mxu0 %v1181_v9 }
  0x53   : > { %1055 = vmatprep.subr.bf16.mxu0 %v1182_v10 }
  0x56   : > { %1056 = vmatpush3.bf16.msra.mxu0 %v1182_v10 }
  0x57   : > { %1093 = vmatprep.subr.bf16.mxu0 %v1473_v15 }
  0x59   : > { %1058 = vmatmul.mubr.bf16.vlgmr.msra.gmra.mrb[0].mxu0 %v316_v16 }
  0x5a   : > { %1061 = vmatprep.mubr.bf16.mxu0 %v317_v17  ;;  %1094 = vmatpush3.bf16.msra.mxu0 %v1473_v15 }
  0x5b   : > { %1095 = vmatprep.subr.bf16.mxu0 %v1479_v18 }
  0x5e   : > { %1096 = vmatpush3.bf16.msra.mxu0 %v1479_v18 }
  0x5f   : > { %1097 = vmatprep.subr.bf16.mxu0 %v1490_v23 }
  0x61   : > { %1062 = vmatmul.mubr.bf16.gmra.mrb[4].mxu0 %v318_v24  ;;  %v565_v24 = vld [vmem:[%s1675_s2] sm:$0x3] }
  0x62   : > { %1065 = vmatprep.mubr.bf16.mxu0 %v319_v25  ;;  %1098 = vmatpush3.bf16.msra.mxu0 %v1490_v23 }
  0x63   : > { %1099 = vmatprep.subr.bf16.mxu0 %v1504_v35 }
  0x66   : > { %1100 = vmatpush3.bf16.msra.mxu0 %v1504_v35 }
  0x69   : > { %1066 = vmatmul.mubr.bf16.gmra.mrb[8].mxu0 %v320_v30 }
  0x6a   : > { %1069 = vmatprep.mubr.bf16.mxu0 %v321_v31 }
  0x71   : > { %1070 = vmatmul.mubr.bf16.gmra.mrb[12].mxu0 %v322_v34 }
 0x12c   : > { %v1059_v37 = vpop.f32.mrb[0].mxu0 }
 0x12d   : > { %v990_v38 = vpack.c.bf16 %v1059_v37, %v1059_v37  ;;  %v421_v39 = vpop.f32.mrb[1].mxu0 }
 0x12e   : > { %v988_v40 = vpack.c.bf16 %v421_v39, %v421_v39  ;;  %v1060_v41 = vpop.f32.mrb[2].mxu0 }
 0x12f   : > { %551 = vst.msk [vmem:[%s1517_s18 + $0x8] sm:$0xf] %vm548_vm1, %v990_v38  ;;  %v485_v42 = vpack.c.bf16 %v1060_v41, %v1059_v37  ;;  %v991_v43 = vpack.c.bf16 %v1060_v41, %v1060_v41  ;;  %v424_v44 = vpop.f32.mrb[3].mxu0 }
 0x130   : > { %549 = vst.msk [vmem:[%s1517_s18] sm:$0xf] %vm548_vm1, %v988_v40  ;;  %v484_v45 = vpack.c.bf16 %v424_v44, %v421_v39  ;;  %v989_v46 = vpack.c.bf16 %v424_v44, %v424_v44 }
 0x131   : > { %552 = vst.msk [vmem:[%s1517_s18 + $0xc] sm:$0xf] %vm548_vm1, %v991_v43  ;;  %v574_v58 = vsel %vm566_vm2, %v485_v42, 0 }
 0x132   : > { %550 = vst.msk [vmem:[%s1517_s18 + $0x4] sm:$0xf] %vm548_vm1, %v989_v46  ;;  %1101 = vmatprep.mubr.msk.bf16.mxu0 %vm566_vm2, %v484_v45  ;;  %v571_v47 = vsel %vm566_vm2, %v484_v45, 0 }
 0x133   : > { %1074 = vmatpush3.bf16.xpose.msra.mxu1 %v571_v47  ;;  %1102 = vmatmul.mubr.msk.bf16.vlgmr.msra.gmra.mrb[16].mxu0 %vm566_vm2, %v485_v42 }
 0x134   : > { %v1063_v48 = vpop.f32.mrb[4].mxu0  ;;  %1075 = vmatprep.subr.bf16.mxu1 %v1288_v36 }
 0x135   : > { %v994_v49 = vpack.c.bf16 %v1063_v48, %v1063_v48  ;;  %v437_v50 = vpop.f32.mrb[5].mxu0 }
 0x136   : > { %v992_v51 = vpack.c.bf16 %v437_v50, %v437_v50  ;;  %v1064_v52 = vpop.f32.mrb[6].mxu0 }
 0x137   : > { %555 = vst.msk [vmem:[%s1517_s18 + $0x18] sm:$0xf] %vm548_vm1, %v994_v49  ;;  %v487_v53 = vpack.c.bf16 %v1064_v52, %v1063_v48  ;;  %v995_v54 = vpack.c.bf16 %v1064_v52, %v1064_v52  ;;  %v440_v55 = vpop.f32.mrb[7].mxu0 }
 0x138   : > { %553 = vst.msk [vmem:[%s1517_s18 + $0x10] sm:$0xf] %vm548_vm1, %v992_v51  ;;  %v486_v56 = vpack.c.bf16 %v440_v55, %v437_v50  ;;  %v993_v57 = vpack.c.bf16 %v440_v55, %v440_v55 }
 0x139   : > { %556 = vst.msk [vmem:[%s1517_s18 + $0x1c] sm:$0xf] %vm548_vm1, %v995_v54  ;;  %v580_v17 = vsel %vm566_vm2, %v487_v53, 0 }
 0x13a   : > { %554 = vst.msk [vmem:[%s1517_s18 + $0x14] sm:$0xf] %vm548_vm1, %v993_v57  ;;  %1105 = vmatprep.mubr.msk.bf16.mxu0 %vm566_vm2, %v486_v56  ;;  %v577_v5 = vsel %vm566_vm2, %v486_v56, 0 }
 0x13b   : > { %1076 = vmatpush3.bf16.xpose.msra.mxu1 %v574_v58  ;;  %1106 = vmatmul.mubr.msk.bf16.gmra.mrb[20].mxu0 %vm566_vm2, %v487_v53 }
 0x13c   : > { %1077 = vmatprep.subr.bf16.mxu1 %v1288_v36  ;;  %v1067_v59 = vpop.f32.mrb[8].mxu0 }
 0x13d   : > { %v998_v60 = vpack.c.bf16 %v1067_v59, %v1067_v59  ;;  %v453_v61 = vpop.f32.mrb[9].mxu0 }
 0x13e   : > { %v996_v62 = vpack.c.bf16 %v453_v61, %v453_v61  ;;  %v1068_v63 = vpop.f32.mrb[10].mxu0 }
 0x13f   : > { %559 = vst.msk [vmem:[%s1517_s18 + $0x28] sm:$0xf] %vm548_vm1, %v998_v60  ;;  %v489_v0 = vpack.c.bf16 %v1068_v63, %v1067_v59  ;;  %v999_v1 = vpack.c.bf16 %v1068_v63, %v1068_v63  ;;  %v456_v2 = vpop.f32.mrb[11].mxu0 }
 0x140   : > { %557 = vst.msk [vmem:[%s1517_s18 + $0x20] sm:$0xf] %vm548_vm1, %v996_v62  ;;  %v488_v3 = vpack.c.bf16 %v456_v2, %v453_v61  ;;  %v997_v4 = vpack.c.bf16 %v456_v2, %v456_v2 }
 0x141   : > { %560 = vst.msk [vmem:[%s1517_s18 + $0x2c] sm:$0xf] %vm548_vm1, %v999_v1  ;;  %v586_v20 = vsel %vm566_vm2, %v489_v0, 0 }
 0x142   : > { %558 = vst.msk [vmem:[%s1517_s18 + $0x24] sm:$0xf] %vm548_vm1, %v997_v4  ;;  %1109 = vmatprep.mubr.msk.bf16.mxu0 %vm566_vm2, %v488_v3  ;;  %v583_v19 = vsel %vm566_vm2, %v488_v3, 0 }
 0x143   : > { %1078 = vmatpush3.bf16.xpose.msra.mxu1 %v577_v5  ;;  %1110 = vmatmul.mubr.msk.bf16.gmra.mrb[24].mxu0 %vm566_vm2, %v489_v0 }
 0x144   : > { %1079 = vmatprep.subr.bf16.mxu1 %v1288_v36  ;;  %v1071_v6 = vpop.f32.mrb[12].mxu0 }
 0x145   : > { %v1002_v7 = vpack.c.bf16 %v1071_v6, %v1071_v6  ;;  %v469_v8 = vpop.f32.mrb[13].mxu0 }
 0x146   : > { %v1000_v9 = vpack.c.bf16 %v469_v8, %v469_v8  ;;  %v1072_v10 = vpop.f32.mrb[14].mxu0 }
 0x147   : > { %563 = vst.msk [vmem:[%s1517_s18 + $0x38] sm:$0xf] %vm548_vm1, %v1002_v7  ;;  %v491_v11 = vpack.c.bf16 %v1072_v10, %v1071_v6  ;;  %v1003_v12 = vpack.c.bf16 %v1072_v10, %v1072_v10  ;;  %v472_v13 = vpop.f32.mrb[15].mxu0 }
 0x148   : > { %561 = vst.msk [vmem:[%s1517_s18 + $0x30] sm:$0xf] %vm548_vm1, %v1000_v9  ;;  %v490_v14 = vpack.c.bf16 %v472_v13, %v469_v8  ;;  %v1001_v16 = vpack.c.bf16 %v472_v13, %v472_v13 }
 0x149   : > { %564 = vst.msk [vmem:[%s1517_s18 + $0x3c] sm:$0xf] %vm548_vm1, %v1003_v12  ;;  %v592_v22 = vsel %vm566_vm2, %v491_v11, 0 }
 0x14a   : > { %562 = vst.msk [vmem:[%s1517_s18 + $0x34] sm:$0xf] %vm548_vm1, %v1001_v16  ;;  %v589_v21 = vsel %vm566_vm2, %v490_v14, 0  ;;  %s787_s18 = scalar_lea.sflag [#allocation4], %s1430_s29 }
 0x14b   : > { %1080 = vmatpush3.bf16.xpose.msra.mxu1 %v580_v17 }
 0x14c   : > { %1081 = vmatprep.subr.bf16.mxu1 %v1288_v36 }
 0x153   : > { %1082 = vmatpush3.bf16.xpose.msra.mxu1 %v583_v19 }
 0x154   : > { %1083 = vmatprep.subr.bf16.mxu1 %v1288_v36 }
 0x15b   : > { %1084 = vmatpush3.bf16.xpose.msra.mxu1 %v586_v20 }
 0x15c   : > { %1085 = vmatprep.subr.bf16.mxu1 %v1288_v36 }
 0x163   : > { %1086 = vmatpush3.bf16.xpose.msra.mxu1 %v589_v21 }
 0x164   : > { %1087 = vmatprep.subr.bf16.mxu1 %v1288_v36 }
 0x16b   : > { %1088 = vmatpush3.bf16.xpose.msra.mxu1 %v592_v22 }
 0x16c   : > { %1117 = vmatprep.subr.bf16.mxu1 %v1473_v15 }
 0x172   : > { %1090 = vmatmul.mubr.msk.bf16.vlgmr.msra.gmra.mrb[0].mxu1 %vm566_vm2, %v565_v24 }
 0x173   : > { %1121 = vmatpush3.bf16.msra.mxu1 %v1473_v15  ;;  %1113 = vmatprep.mubr.msk.bf16.mxu1 %vm566_vm2, %v490_v14 }
 0x174   : > { %1118 = vmatprep.subr.bf16.mxu1 %v1479_v18 }
 0x177   : > { %1122 = vmatpush3.bf16.msra.mxu1 %v1479_v18 }
 0x178   : > { %1119 = vmatprep.subr.bf16.mxu1 %v1490_v23 }
 0x17b   : > { %1123 = vmatpush3.bf16.msra.mxu1 %v1490_v23 }
 0x17c   : > { %1120 = vmatprep.subr.bf16.mxu1 %v1504_v35 }
 0x17f   : > { %1124 = vmatpush3.bf16.msra.mxu1 %v1504_v35 }
 0x182   : > { %1114 = vmatmul.mubr.msk.bf16.vlgmr.msra.gmra.mrb[4].mxu1 %vm566_vm2, %v491_v11 }
 0x206   : > { %v1103_v15 = vpop.f32.mrb[16].mxu0 }
 0x207   : > { %767 = vst.msk [vmem:[%s1590_s15 + $0x10] sm:$0xff] %vm764_vm3, %v1103_v15  ;;  %v701_v18 = vpop.f32.mrb[17].mxu0 }
 0x208   : > { %765 = vst.msk [vmem:[%s1590_s15] sm:$0xff] %vm764_vm3, %v701_v18  ;;  %v1104_v23 = vpop.f32.mrb[18].mxu0 }
 0x209   : > { %768 = vst.msk [vmem:[%s1590_s15 + $0x18] sm:$0xff] %vm764_vm3, %v1104_v23  ;;  %v704_v25 = vpop.f32.mrb[19].mxu0 }
 0x20a   : > { %766 = vst.msk [vmem:[%s1590_s15 + $0x8] sm:$0xff] %vm764_vm3, %v704_v25 }
 0x20e   : > { %v1107_v26 = vpop.f32.mrb[20].mxu0 }
 0x20f   : > { %771 = vst.msk [vmem:[%s1590_s15 + $0x30] sm:$0xff] %vm764_vm3, %v1107_v26  ;;  %v717_v27 = vpop.f32.mrb[21].mxu0 }
 0x210   : > { %769 = vst.msk [vmem:[%s1590_s15 + $0x20] sm:$0xff] %vm764_vm3, %v717_v27  ;;  %v1108_v28 = vpop.f32.mrb[22].mxu0 }
 0x211   : > { %772 = vst.msk [vmem:[%s1590_s15 + $0x38] sm:$0xff] %vm764_vm3, %v1108_v28  ;;  %v720_v29 = vpop.f32.mrb[23].mxu0 }
 0x212   : > { %770 = vst.msk [vmem:[%s1590_s15 + $0x28] sm:$0xff] %vm764_vm3, %v720_v29 }
 0x216   : > { %v1111_v30 = vpop.f32.mrb[24].mxu0 }
 0x217   : > { %775 = vst.msk [vmem:[%s1590_s15 + $0x50] sm:$0xff] %vm764_vm3, %v1111_v30  ;;  %v733_v31 = vpop.f32.mrb[25].mxu0 }
 0x218   : > { %773 = vst.msk [vmem:[%s1590_s15 + $0x40] sm:$0xff] %vm764_vm3, %v733_v31  ;;  %v1112_v32 = vpop.f32.mrb[26].mxu0 }
 0x219   : > { %776 = vst.msk [vmem:[%s1590_s15 + $0x58] sm:$0xff] %vm764_vm3, %v1112_v32  ;;  %v736_v33 = vpop.f32.mrb[27].mxu0 }
 0x21a   : > { %774 = vst.msk [vmem:[%s1590_s15 + $0x48] sm:$0xff] %vm764_vm3, %v736_v33 }
 0x245   : > { %v628_v34 = vpop.f32.mrb[0].mxu1 }
 0x246   : > { %634 = vst [vmem:[%s277_s26] sm:$0xf] %v628_v34  ;;  %v1091_v35 = vpop.f32.mrb[1].mxu1 }
 0x247   : > { %v631_v36 = vpop.f32.mrb[2].mxu1 }
 0x248   : > { %1230 = shalt.err (!%p1227_p4)
}
 0x249   : > { %s1231_s29 = scalar_lea.hbm %s1623_s16, 64  ;;  %s1235_s17 = scalar_lea.hbm %s1678_s5, 128 }
 0x24a   : > { %p1232_p5 = scmp.ne.s32.totalorder %s1623_s16, %s1231_s29  ;;  %p1236_p1 = scmp.lt.u32.totalorder %s1623_s16, %s1678_s5 }
 0x24b   : > { %p1237_p3 = scmp.lt.u32.totalorder %s1235_s17, %s1231_s29  ;;  %p1239_p11 = scmp.lt.u32.totalorder %s1231_s29, %s1623_s16 }
 0x24c   : > { %p1233_p7 = pnand %p1232_p5, %p1686_p12 }
 0x24d   : > { %p1238_p6 = por %p1237_p3, %p1236_p1 }
 0x24e   : > { %p1234_p9 = pneg %p1233_p7 }
 0x24f   : > { %p1240_p13 = por %p1239_p11, %p1238_p6 }
 0x251   : > { %p1241_p8 = pnand %p1240_p13, %p1234_p9 }
 0x253   : > { %1244 = shalt.err (!%p1241_p8)
}
 0x254   : > { %1127 = dma.vmem_to_hbm [thread:$0]  (%p1686_p12), %s1618_s28, 64, %s1623_s16, %s787_s18   ;;  %v1092_v37 = vpop.f32.mrb[3].mxu1 }
 0x255   : > { %v1115_v38 = vpop.f32.mrb[4].mxu1 }
 0x256   : > { %779 = vst.msk [vmem:[%s1590_s15 + $0x70] sm:$0xff] %vm764_vm3, %v1115_v38  ;;  %v749_v39 = vpop.f32.mrb[5].mxu1 }
 0x257   : > { %777 = vst.msk [vmem:[%s1590_s15 + $0x60] sm:$0xff] %vm764_vm3, %v749_v39  ;;  %v1116_v40 = vpop.f32.mrb[6].mxu1 }
 0x258   : > { %780 = vst.msk [vmem:[%s1590_s15 + $0x78] sm:$0xff] %vm764_vm3, %v1116_v40  ;;  %v752_v41 = vpop.f32.mrb[7].mxu1 }
 0x259   : > { %778 = vst.msk [vmem:[%s1590_s15 + $0x68] sm:$0xff] %vm764_vm3, %v752_v41 }
 0x25a PF: > { %s833_s9 = sand.u32 1, %s1271_s21   ;;  %p1687_p10 = scmp.ne.s32.totalorder %s1684_s10, 0 }
 0x25b   : > { %p1688_p12 = scmp.ge.s32.totalorder %s1283_s24, 2  ;;  %s834_s28 = scalar_lea.sflag [#allocation4], %s833_s9 }
 0x25d   : > { %p1134_p0 = pnand %p1688_p12, %p1687_p10 }
 0x25f   : > { %1266 = dma.done.wait (!%p1134_p0), %s834_s28, 64  }
 0x260   : > { %1268 = vsyncadd (!%p1134_p0), %s834_s28, 4294967232  ;;  %p20_p2 = scmp.ge.s32.totalorder %s1351_s27, 4   ;;  %s1689_s21 = smov %s1275_s22 }
 0x261   : > { %s1690_s22 = smov %s1279_s23  ;;  %s1691_s23 = smov %s1363_s30 }
 0x262   : > { %s1692_s24 = smov %s1351_s27  ;;  %22 = sbr.rel (!%p20_p2) target bundleno = 5 (0x5), region = 105 }
 0x269   :  { %847 = vsyncpa [#allocation3], 1 }
 0x26a   :  { %849 = vsyncpa [#allocation3 + $0x1], 1 }
 0x26b   :  { %850 = vsyncpa [#allocation4], 1 }
 0x26c   :  { %852 = vsyncpa [#allocation4 + $0x1], 1 }

</bundles_post_ra>
